<compile_context>
chip_gen: v5e
topology: v5e:2x2
jax: 0.10.0
libtpu: 0.0.40
codegen_flags: <defaults>
</compile_context>

<pallas_src>
import math
import functools

import jax
import jax.numpy as jnp
from jax.experimental import pallas as pl
from jax.experimental.pallas import tpu as pltpu


def mha_kernel(q_ref, k_ref, v_ref,
               wq_ref, bq_ref, wk_ref, bk_ref, wv_ref, bv_ref, wo_ref, bo_ref,
               out_ref, attn_ref,
               acc_ref, k_scr, v_scr,
               *, heads_per_group, head_dim, num_groups, compute_dtype):
    qi = pl.program_id(1)
    gi = pl.program_id(2)
    g, hd = heads_per_group, head_dim
    f32 = jnp.float32
    L = k_scr.shape[2]
    H = wo_ref.shape[2]

    # ---- K/V projection for this head group: once per (batch, group), cached in VMEM.
    # Produced in (G, L) layout (features major, sequence in lanes) so the per-head split below
    # is a free leading-dim reshape.
    @pl.when(qi == 0)
    def _():
        k_in = k_ref[0].astype(compute_dtype)                                  # (L, H)
        v_in = v_ref[0].astype(compute_dtype)
        k_h = jax.lax.dot_general(wk_ref[0], k_in, (((1,), (1,)), ((), ())),
                                  preferred_element_type=f32) + bk_ref[0]      # (G, L) f32
        v_h = jax.lax.dot_general(wv_ref[0], v_in, (((1,), (1,)), ((), ())),
                                  preferred_element_type=f32) + bv_ref[0]
        k_scr[gi] = k_h.astype(compute_dtype)
        v_scr[gi] = v_h.astype(compute_dtype)

    # ---- Q projection for this (query tile, head group). Scale is pre-folded into Wq/bq.
    q_in = q_ref[0].astype(compute_dtype)                                      # (TQ, H)
    q_h = jax.lax.dot_general(wq_ref[0], q_in, (((1,), (1,)), ((), ())),
                              preferred_element_type=f32) + bq_ref[0]          # (G, TQ) f32
    tq = q_h.shape[1]

    q3 = q_h.astype(compute_dtype).reshape(g, hd, tq)                          # (g, hd, TQ)
    k3 = k_scr[gi].reshape(g, hd, L)                                           # (g, hd, L)
    v3 = v_scr[gi].reshape(g, hd, L)

    # ---- per-head scaled dot-product: energy[h,q,k] = sum_d q3[h,d,q] * k3[h,d,k]
    energy = jax.lax.dot_general(q3, k3, (((1,), (1,)), ((0,), (0,))),
                                 preferred_element_type=f32)                   # (g, TQ, L) f32
    m = jnp.max(energy, axis=-1, keepdims=True)
    e = jnp.exp(energy - m)
    s = jnp.sum(e, axis=-1, keepdims=True)
    attn = e * pl.reciprocal(s, approx=True)                                   # (g, TQ, L) f32
    attn_ref[0] = attn.astype(attn_ref.dtype)

    # ---- context and this group's contribution to the output projection.
    p = attn.astype(compute_dtype)
    ctx = jax.lax.dot_general(p, v3, (((2,), (2,)), ((0,), (0,))),
                              preferred_element_type=f32)                      # (g, TQ, hd)
    wo3 = wo_ref[0].reshape(g, hd, H)                                          # (g, hd, H)
    partial = jax.lax.dot_general(ctx.astype(compute_dtype), wo3,
                                  (((2,), (1,)), ((0,), (0,))),
                                  preferred_element_type=f32)                  # (g, TQ, H)
    contrib = jnp.sum(partial, axis=0)                                         # (TQ, H) f32

    if num_groups == 1:
        out_ref[0] = (contrib + bo_ref[...]).astype(out_ref.dtype)
    else:
        @pl.when(gi == 0)
        def _():
            acc_ref[...] = contrib

        @pl.when(gi > 0)
        def _():
            acc_ref[...] += contrib

        @pl.when(gi == num_groups - 1)
        def _():
            out_ref[0] = (acc_ref[...] + bo_ref[...]).astype(out_ref.dtype)


def _pick_head_group(n_heads, head_dim, target=256):
    """Smallest divisor g of n_heads with g*head_dim >= target (else all heads)."""
    g = 1
    for cand in range(1, n_heads + 1):
        if n_heads % cand == 0:
            g = cand
            if cand * head_dim >= target:
                break
    return g


def _pick_query_tile(seq_len, heads_per_group, budget_bytes=12 << 20):
    """Largest query tile dividing seq_len whose f32 softmax working set fits the budget."""
    pad_l = -(-seq_len // 128) * 128
    divisors = [t for t in (512, 256, 128, 64, 32, 16, 8) if seq_len % t == 0]
    if not divisors:
        return seq_len
    for t in divisors:
        if 4 * heads_per_group * t * pad_l * 4 <= budget_bytes:
            return t
    return divisors[-1]


def multi_head_attention(query, key, value, params, *, n_heads,
                         compute_dtype=jnp.bfloat16, attn_dtype=jnp.bfloat16):
    """query/key/value: (B, L, H).  params hold transposed weights (y = x @ W^T + b)."""
    B, L, H = query.shape
    assert H % n_heads == 0
    hd = H // n_heads
    g = _pick_head_group(n_heads, hd)
    G = g * hd
    n_groups = n_heads // g
    tq = _pick_query_tile(L, g)
    n_q = L // tq
    inv_scale = 1.0 / math.sqrt(float(hd))

    # Per-group parameter tensors: wrapper-side reshape + bf16 cast only. Rows of W^T (i.e. W
    # itself) are grouped so each block is (G, H) with H lane-dense; scale folded into Wq/bq.
    wq_g = (params["wq_t"] * inv_scale).T.reshape(n_groups, G, H).astype(compute_dtype)
    wk_g = params["wk_t"].T.reshape(n_groups, G, H).astype(compute_dtype)
    wv_g = params["wv_t"].T.reshape(n_groups, G, H).astype(compute_dtype)
    bq_g = (params["bq"] * inv_scale).reshape(n_groups, G, 1).astype(jnp.float32)
    bk_g = params["bk"].reshape(n_groups, G, 1).astype(jnp.float32)
    bv_g = params["bv"].reshape(n_groups, G, 1).astype(jnp.float32)
    wo_g = params["wo_t"].reshape(n_groups, G, H).astype(compute_dtype)
    bo = params["bo"].reshape(1, H).astype(jnp.float32)

    kernel = functools.partial(
        mha_kernel, heads_per_group=g, head_dim=hd, num_groups=n_groups,
        compute_dtype=compute_dtype)

    act_q = pl.BlockSpec((1, tq, H), lambda b, qi, gi: (b, qi, 0))
    act_kv = pl.BlockSpec((1, L, H), lambda b, qi, gi: (b, 0, 0))
    w_spec = pl.BlockSpec((1, G, H), lambda b, qi, gi: (gi, 0, 0))
    b_spec = pl.BlockSpec((1, G, 1), lambda b, qi, gi: (gi, 0, 0))
    bo_spec = pl.BlockSpec((1, H), lambda b, qi, gi: (0, 0))
    out_spec = pl.BlockSpec((1, tq, H), lambda b, qi, gi: (b, qi, 0))
    attn_spec = pl.BlockSpec((1, g, tq, L), lambda b, qi, gi: (b, gi, qi, 0))

    # ---- VMEM budget: double-buffered blocks + scratch + f32 temporaries, with lane/sublane
    # padding, capped at 3/4 of physical VMEM (leaves compiler headroom on v7x's 64 MiB).
    def pad(n, m):
        return -(-n // m) * m

    in_sz = jnp.dtype(query.dtype).itemsize
    c_sz = jnp.dtype(compute_dtype).itemsize
    a_sz = jnp.dtype(attn_dtype).itemsize
    sub_in = 8 * max(1, 4 // in_sz)
    sub_c = 8 * max(1, 4 // c_sz)
    sub_a = 8 * max(1, 4 // a_sz)
    padH, padL = pad(H, 128), pad(L, 128)

    block_bytes = (
        pad(tq, sub_in) * padH * in_sz                  # q block
        + 2 * pad(L, sub_in) * padH * in_sz             # k, v blocks
        + 4 * pad(G, sub_c) * padH * c_sz               # wq, wk, wv, wo blocks
        + 3 * pad(G, 8) * 128 * 4                       # bq, bk, bv (lane-padded)
        + 8 * padH * 4                                  # bo
        + pad(tq, sub_in) * padH * in_sz                # out block
        + g * pad(tq, sub_a) * padL * a_sz)             # attention-probability block
    scratch_bytes = (pad(tq, 8) * padH * 4
                     + 2 * n_groups * pad(G, sub_c) * padL * c_sz)
    temp_bytes = (3 * g * pad(tq, 8) * padL * 4         # energy / e / attn (f32)
                  + 2 * pad(G, 8) * padL * 4            # K/V projections before cast
                  + (g + 3) * pad(tq, 8) * padH * 4)    # q proj, ctx, partial, contrib
    est = 2 * block_bytes + scratch_bytes + temp_bytes + (2 << 20)

    try:
        phys_vmem = int(pltpu.get_tpu_info().vmem_capacity_bytes)
    except Exception:
        phys_vmem = 64 << 20                            # conservative (v7x per-core floor)
    cap = (phys_vmem * 3) // 4
    vmem_limit = int(min(cap, max(32 << 20, est)))

    out, attn = pl.pallas_call(
        kernel,
        out_shape=(
            jax.ShapeDtypeStruct((B, L, H), query.dtype),
            jax.ShapeDtypeStruct((B, n_heads, L, L), attn_dtype),
        ),
        grid_spec=pltpu.PrefetchScalarGridSpec(
            num_scalar_prefetch=0,
            grid=(B, n_q, n_groups),
            in_specs=[
                act_q, act_kv, act_kv,
                w_spec, b_spec,    # Wq (scaled), bq (scaled)
                w_spec, b_spec,    # Wk, bk
                w_spec, b_spec,    # Wv, bv
                w_spec, bo_spec,   # Wo^T rows per group, bo
            ],
            out_specs=[out_spec, attn_spec],
            scratch_shapes=[
                pltpu.VMEM((tq, H), jnp.float32),              # output-projection accumulator
                pltpu.VMEM((n_groups, G, L), compute_dtype),   # cached per-group K projection
                pltpu.VMEM((n_groups, G, L), compute_dtype),   # cached per-group V projection
            ],
        ),
        compiler_params=pltpu.CompilerParams(
            # batch is megacore-parallel; the group axis accumulates into the output block and
            # the query-tile axis reuses the cached K/V scratch, so both stay "arbitrary".
            dimension_semantics=("parallel", "arbitrary", "arbitrary"),
            vmem_limit_bytes=vmem_limit),
    )(query, key, value,
      wq_g, bq_g, wk_g, bk_g, wv_g, bv_g, wo_g, bo)
    return out, attn


def reference_mha(query, key, value, params, *, n_heads):
    """Pure-JAX f32 reference mirroring the PyTorch forward (eval mode)."""
    B, L, H = query.shape
    hd = H // n_heads
    Q = query @ params["wq_t"] + params["bq"]
    K = key @ params["wk_t"] + params["bk"]
    V = value @ params["wv_t"] + params["bv"]
    Q = Q.reshape(B, L, n_heads, hd).transpose(0, 2, 1, 3)
    K = K.reshape(B, L, n_heads, hd).transpose(0, 2, 1, 3)
    V = V.reshape(B, L, n_heads, hd).transpose(0, 2, 1, 3)
    energy = jnp.einsum("bhqd,bhkd->bhqk", Q, K) / math.sqrt(hd)
    attn = jax.nn.softmax(energy, axis=-1)
    x = jnp.einsum("bhqk,bhkd->bhqd", attn, V)
    x = x.transpose(0, 2, 1, 3).reshape(B, L, H)
    x = x @ params["wo_t"] + params["bo"]
    return x, attn


if __name__ == "__main__":
    B, L, H, n_heads = 2, 8, 32, 4

    key0 = jax.random.PRNGKey(0)
    ks = jax.random.split(key0, 12)

    def init_w(k):
        return jax.random.normal(k, (H, H), jnp.float32) * 0.05

    def init_b(k):
        return jax.random.normal(k, (1, H), jnp.float32) * 0.05

    params = {
        "wq_t": init_w(ks[0]), "bq": init_b(ks[1]),
        "wk_t": init_w(ks[2]), "bk": init_b(ks[3]),
        "wv_t": init_w(ks[4]), "bv": init_b(ks[5]),
        "wo_t": init_w(ks[6]), "bo": init_b(ks[7]),
    }

    query = jax.random.normal(ks[8], (B, L, H), jnp.float32)
    key_in = jax.random.normal(ks[9], (B, L, H), jnp.float32)
    value = jax.random.normal(ks[10], (B, L, H), jnp.float32)

    out, attn = multi_head_attention(query, key_in, value, params, n_heads=n_heads)
    out = jax.block_until_ready(out)
    attn = jax.block_until_ready(attn)

    out_ref, attn_ref = reference_mha(query, key_in, value, params, n_heads=n_heads)

    assert out.shape == (B, L, H)
    assert attn.shape == (B, n_heads, L, L)
    # bf16 MXU inputs, bf16 stored probabilities, approx reciprocal -> bf16-level tolerance.
    assert jnp.allclose(out, out_ref, atol=2e-2, rtol=2e-2)
    assert jnp.allclose(attn.astype(jnp.float32), attn_ref, atol=2e-2, rtol=2e-2)

    print("KERNEL_OK")
</pallas_src>

<mosaic_0001>
module attributes {stable_mosaic.version = 11 : i64} {
  func.func @mha_kernel(%arg0: i32, %arg1: i32, %arg2: i32, %arg3: memref<1x8x32xf32, #tpu.memory_space<vmem>>, %arg4: memref<1x8x32xf32, #tpu.memory_space<vmem>>, %arg5: memref<1x8x32xf32, #tpu.memory_space<vmem>>, %arg6: memref<1x32x32xbf16, #tpu.memory_space<vmem>>, %arg7: memref<1x32x1xf32, #tpu.memory_space<vmem>>, %arg8: memref<1x32x32xbf16, #tpu.memory_space<vmem>>, %arg9: memref<1x32x1xf32, #tpu.memory_space<vmem>>, %arg10: memref<1x32x32xbf16, #tpu.memory_space<vmem>>, %arg11: memref<1x32x1xf32, #tpu.memory_space<vmem>>, %arg12: memref<1x32x32xbf16, #tpu.memory_space<vmem>>, %arg13: memref<1x32xf32, #tpu.memory_space<vmem>>, %arg14: memref<1x8x32xf32, #tpu.memory_space<vmem>>, %arg15: memref<1x4x8x8xbf16, #tpu.memory_space<vmem>>, %arg16: memref<8x32xf32, #tpu.memory_space<vmem>>, %arg17: memref<1x32x8xbf16, #tpu.memory_space<vmem>>, %arg18: memref<1x32x8xbf16, #tpu.memory_space<vmem>>) attributes {dimension_semantics = [#tpu.dimension_semantics<parallel>, #tpu.dimension_semantics<arbitrary>, #tpu.dimension_semantics<arbitrary>], iteration_bounds = array<i64: 2, 1, 1>, scalar_prefetch = 0 : i64, scratch_operands = 3 : i64, tpu.core_type = #tpu.core_type<tc>, window_params = [{transform_indices = @transform_0, window_bounds = array<i64: 1, 8, 32>}, {transform_indices = @transform_1, window_bounds = array<i64: 1, 8, 32>}, {transform_indices = @transform_2, window_bounds = array<i64: 1, 8, 32>}, {transform_indices = @transform_3, window_bounds = array<i64: 1, 32, 32>}, {transform_indices = @transform_4, window_bounds = array<i64: 1, 32, 1>}, {transform_indices = @transform_5, window_bounds = array<i64: 1, 32, 32>}, {transform_indices = @transform_6, window_bounds = array<i64: 1, 32, 1>}, {transform_indices = @transform_7, window_bounds = array<i64: 1, 32, 32>}, {transform_indices = @transform_8, window_bounds = array<i64: 1, 32, 1>}, {transform_indices = @transform_9, window_bounds = array<i64: 1, 32, 32>}, {pipeline_mode = #tpu.pipeline_mode<synchronous>, transform_indices = @transform_10, window_bounds = array<i64: 1, 32>}, {transform_indices = @transform_11, window_bounds = array<i64: 1, 8, 32>}, {transform_indices = @transform_12, window_bounds = array<i64: 1, 4, 8, 8>}]} {
    %c0_i32 = arith.constant 0 : i32
    %0 = arith.cmpi eq, %arg1, %c0_i32 : i32
    %1 = arith.extui %0 : i1 to i32
    %c0_i32_0 = arith.constant 0 : i32
    %2 = arith.cmpi ne, %1, %c0_i32_0 : i32
    scf.if %2 {
      %c0_31 = arith.constant 0 : index
      %c0_32 = arith.constant 0 : index
      %c0_33 = arith.constant 0 : index
      %52 = vector.load %arg4[%c0_31, %c0_32, %c0_33] : memref<1x8x32xf32, #tpu.memory_space<vmem>>, vector<1x8x32xf32>
      %53 = vector.shape_cast %52 : vector<1x8x32xf32> to vector<8x32xf32>
      %54 = arith.truncf %53 : vector<8x32xf32> to vector<8x32xbf16>
      %c0_34 = arith.constant 0 : index
      %c0_35 = arith.constant 0 : index
      %c0_36 = arith.constant 0 : index
      %55 = vector.load %arg5[%c0_34, %c0_35, %c0_36] : memref<1x8x32xf32, #tpu.memory_space<vmem>>, vector<1x8x32xf32>
      %56 = vector.shape_cast %55 : vector<1x8x32xf32> to vector<8x32xf32>
      %57 = arith.truncf %56 : vector<8x32xf32> to vector<8x32xbf16>
      %c0_37 = arith.constant 0 : index
      %c0_38 = arith.constant 0 : index
      %c0_39 = arith.constant 0 : index
      %58 = vector.load %arg8[%c0_37, %c0_38, %c0_39] : memref<1x32x32xbf16, #tpu.memory_space<vmem>>, vector<1x32x32xbf16>
      %59 = vector.shape_cast %58 : vector<1x32x32xbf16> to vector<32x32xbf16>
      %cst_40 = arith.constant dense<0.000000e+00> : vector<32x8xf32>
      %60 = tpu.matmul %59, %54, %cst_40 {dimension_numbers = #tpu.dot_dimension_numbers<[1], [1], [0], [0], [0, 0, 1, 0], [], []>} : vector<32x32xbf16>, vector<8x32xbf16>, vector<32x8xf32> -> vector<32x8xf32>
      %c0_41 = arith.constant 0 : index
      %c0_42 = arith.constant 0 : index
      %c0_43 = arith.constant 0 : index
      %61 = vector.load %arg9[%c0_41, %c0_42, %c0_43] : memref<1x32x1xf32, #tpu.memory_space<vmem>>, vector<1x32x1xf32>
      %62 = vector.shape_cast %61 : vector<1x32x1xf32> to vector<32x1xf32>
      %63 = vector.broadcast %62 : vector<32x1xf32> to vector<32x8xf32>
      %64 = arith.addf %60, %63 : vector<32x8xf32>
      %c0_44 = arith.constant 0 : index
      %c0_45 = arith.constant 0 : index
      %c0_46 = arith.constant 0 : index
      %65 = vector.load %arg10[%c0_44, %c0_45, %c0_46] : memref<1x32x32xbf16, #tpu.memory_space<vmem>>, vector<1x32x32xbf16>
      %66 = vector.shape_cast %65 : vector<1x32x32xbf16> to vector<32x32xbf16>
      %cst_47 = arith.constant dense<0.000000e+00> : vector<32x8xf32>
      %67 = tpu.matmul %66, %57, %cst_47 {dimension_numbers = #tpu.dot_dimension_numbers<[1], [1], [0], [0], [0, 0, 1, 0], [], []>} : vector<32x32xbf16>, vector<8x32xbf16>, vector<32x8xf32> -> vector<32x8xf32>
      %c0_48 = arith.constant 0 : index
      %c0_49 = arith.constant 0 : index
      %c0_50 = arith.constant 0 : index
      %68 = vector.load %arg11[%c0_48, %c0_49, %c0_50] : memref<1x32x1xf32, #tpu.memory_space<vmem>>, vector<1x32x1xf32>
      %69 = vector.shape_cast %68 : vector<1x32x1xf32> to vector<32x1xf32>
      %70 = vector.broadcast %69 : vector<32x1xf32> to vector<32x8xf32>
      %71 = arith.addf %67, %70 : vector<32x8xf32>
      %72 = arith.truncf %64 : vector<32x8xf32> to vector<32x8xbf16>
      %73 = arith.index_cast %arg2 : i32 to index
      %c0_51 = arith.constant 0 : index
      %c0_52 = arith.constant 0 : index
      %74 = vector.load %arg17[%73, %c0_51, %c0_52] : memref<1x32x8xbf16, #tpu.memory_space<vmem>>, vector<1x32x8xbf16>
      %75 = vector.shape_cast %74 : vector<1x32x8xbf16> to vector<32x8xbf16>
      %76 = vector.shape_cast %72 : vector<32x8xbf16> to vector<1x32x8xbf16>
      tpu.vector_store %arg17[%73, %c0_51, %c0_52], %76 {strides = array<i32>} : memref<1x32x8xbf16, #tpu.memory_space<vmem>>, vector<1x32x8xbf16>,
      %77 = arith.truncf %71 : vector<32x8xf32> to vector<32x8xbf16>
      %78 = arith.index_cast %arg2 : i32 to index
      %c0_53 = arith.constant 0 : index
      %c0_54 = arith.constant 0 : index
      %79 = vector.load %arg18[%78, %c0_53, %c0_54] : memref<1x32x8xbf16, #tpu.memory_space<vmem>>, vector<1x32x8xbf16>
      %80 = vector.shape_cast %79 : vector<1x32x8xbf16> to vector<32x8xbf16>
      %81 = vector.shape_cast %77 : vector<32x8xbf16> to vector<1x32x8xbf16>
      tpu.vector_store %arg18[%78, %c0_53, %c0_54], %81 {strides = array<i32>} : memref<1x32x8xbf16, #tpu.memory_space<vmem>>, vector<1x32x8xbf16>,
    } else {
    }
    %c0 = arith.constant 0 : index
    %c0_1 = arith.constant 0 : index
    %c0_2 = arith.constant 0 : index
    %3 = vector.load %arg3[%c0, %c0_1, %c0_2] : memref<1x8x32xf32, #tpu.memory_space<vmem>>, vector<1x8x32xf32>
    %4 = vector.shape_cast %3 : vector<1x8x32xf32> to vector<8x32xf32>
    %5 = arith.truncf %4 : vector<8x32xf32> to vector<8x32xbf16>
    %c0_3 = arith.constant 0 : index
    %c0_4 = arith.constant 0 : index
    %c0_5 = arith.constant 0 : index
    %6 = vector.load %arg6[%c0_3, %c0_4, %c0_5] : memref<1x32x32xbf16, #tpu.memory_space<vmem>>, vector<1x32x32xbf16>
    %7 = vector.shape_cast %6 : vector<1x32x32xbf16> to vector<32x32xbf16>
    %cst = arith.constant dense<0.000000e+00> : vector<32x8xf32>
    %8 = tpu.matmul %7, %5, %cst {dimension_numbers = #tpu.dot_dimension_numbers<[1], [1], [0], [0], [0, 0, 1, 0], [], []>} : vector<32x32xbf16>, vector<8x32xbf16>, vector<32x8xf32> -> vector<32x8xf32>
    %c0_6 = arith.constant 0 : index
    %c0_7 = arith.constant 0 : index
    %c0_8 = arith.constant 0 : index
    %9 = vector.load %arg7[%c0_6, %c0_7, %c0_8] : memref<1x32x1xf32, #tpu.memory_space<vmem>>, vector<1x32x1xf32>
    %10 = vector.shape_cast %9 : vector<1x32x1xf32> to vector<32x1xf32>
    %11 = vector.broadcast %10 : vector<32x1xf32> to vector<32x8xf32>
    %12 = arith.addf %8, %11 : vector<32x8xf32>
    %13 = arith.truncf %12 : vector<32x8xf32> to vector<32x8xbf16>
    %14 = vector.shape_cast %13 : vector<32x8xbf16> to vector<4x8x8xbf16>
    %15 = arith.index_cast %arg2 : i32 to index
    %c0_9 = arith.constant 0 : index
    %c0_10 = arith.constant 0 : index
    %16 = vector.load %arg17[%15, %c0_9, %c0_10] : memref<1x32x8xbf16, #tpu.memory_space<vmem>>, vector<1x32x8xbf16>
    %17 = vector.shape_cast %16 : vector<1x32x8xbf16> to vector<32x8xbf16>
    %18 = vector.shape_cast %17 : vector<32x8xbf16> to vector<4x8x8xbf16>
    %19 = arith.index_cast %arg2 : i32 to index
    %c0_11 = arith.constant 0 : index
    %c0_12 = arith.constant 0 : index
    %20 = vector.load %arg18[%19, %c0_11, %c0_12] : memref<1x32x8xbf16, #tpu.memory_space<vmem>>, vector<1x32x8xbf16>
    %21 = vector.shape_cast %20 : vector<1x32x8xbf16> to vector<32x8xbf16>
    %22 = vector.shape_cast %21 : vector<32x8xbf16> to vector<4x8x8xbf16>
    %cst_13 = arith.constant dense<0.000000e+00> : vector<4x8x8xf32>
    %23 = tpu.matmul %14, %18, %cst_13 {dimension_numbers = #tpu.dot_dimension_numbers<[1], [1], [2], [2], [0, 0, 0, 2, 1, 2], [0], [0]>} : vector<4x8x8xbf16>, vector<4x8x8xbf16>, vector<4x8x8xf32> -> vector<4x8x8xf32>
    %cst_14 = arith.constant dense<0xFF800000> : vector<4x8xf32>
    %24 = vector.multi_reduction <maximumf>, %23, %cst_14 [2] : vector<4x8x8xf32> to vector<4x8xf32>
    %25 = vector.shape_cast %24 : vector<4x8xf32> to vector<4x8x1xf32>
    %26 = vector.broadcast %25 : vector<4x8x1xf32> to vector<4x8x8xf32>
    %27 = arith.subf %23, %26 : vector<4x8x8xf32>
    %28 = math.exp %27 : vector<4x8x8xf32>
    %cst_15 = arith.constant dense<0.000000e+00> : vector<4x8xf32>
    %29 = vector.multi_reduction <add>, %28, %cst_15 [2] : vector<4x8x8xf32> to vector<4x8xf32>
    %30 = vector.shape_cast %29 : vector<4x8xf32> to vector<4x8x1xf32>
    %31 = tpu.reciprocal %30 {approx = true} : vector<4x8x1xf32> -> vector<4x8x1xf32>
    %32 = vector.broadcast %31 : vector<4x8x1xf32> to vector<4x8x8xf32>
    %33 = arith.mulf %28, %32 : vector<4x8x8xf32>
    %34 = arith.truncf %33 : vector<4x8x8xf32> to vector<4x8x8xbf16>
    %c0_16 = arith.constant 0 : index
    %c0_17 = arith.constant 0 : index
    %c0_18 = arith.constant 0 : index
    %c0_19 = arith.constant 0 : index
    %35 = vector.load %arg15[%c0_16, %c0_17, %c0_18, %c0_19] : memref<1x4x8x8xbf16, #tpu.memory_space<vmem>>, vector<1x4x8x8xbf16>
    %36 = vector.shape_cast %35 : vector<1x4x8x8xbf16> to vector<4x8x8xbf16>
    %37 = vector.shape_cast %34 : vector<4x8x8xbf16> to vector<1x4x8x8xbf16>
    tpu.vector_store %arg15[%c0_16, %c0_17, %c0_18, %c0_19], %37 {strides = array<i32>} : memref<1x4x8x8xbf16, #tpu.memory_space<vmem>>, vector<1x4x8x8xbf16>,
    %38 = arith.truncf %33 : vector<4x8x8xf32> to vector<4x8x8xbf16>
    %cst_20 = arith.constant dense<0.000000e+00> : vector<4x8x8xf32>
    %39 = tpu.matmul %38, %22, %cst_20 {dimension_numbers = #tpu.dot_dimension_numbers<[2], [2], [1], [1], [0, 0, 0, 1, 1, 1], [0], [0]>} : vector<4x8x8xbf16>, vector<4x8x8xbf16>, vector<4x8x8xf32> -> vector<4x8x8xf32>
    %c0_21 = arith.constant 0 : index
    %c0_22 = arith.constant 0 : index
    %c0_23 = arith.constant 0 : index
    %40 = vector.load %arg12[%c0_21, %c0_22, %c0_23] : memref<1x32x32xbf16, #tpu.memory_space<vmem>>, vector<1x32x32xbf16>
    %41 = vector.shape_cast %40 : vector<1x32x32xbf16> to vector<32x32xbf16>
    %42 = vector.shape_cast %41 : vector<32x32xbf16> to vector<4x8x32xbf16>
    %43 = arith.truncf %39 : vector<4x8x8xf32> to vector<4x8x8xbf16>
    %cst_24 = arith.constant dense<0.000000e+00> : vector<4x8x32xf32>
    %44 = tpu.matmul %43, %42, %cst_24 {dimension_numbers = #tpu.dot_dimension_numbers<[2], [1], [1], [2], [0, 0, 0, 1, 1, 2], [0], [0]>} : vector<4x8x8xbf16>, vector<4x8x32xbf16>, vector<4x8x32xf32> -> vector<4x8x32xf32>
    %cst_25 = arith.constant dense<0.000000e+00> : vector<8x32xf32>
    %45 = vector.multi_reduction <add>, %44, %cst_25 [0] : vector<4x8x32xf32> to vector<8x32xf32>
    %c0_26 = arith.constant 0 : index
    %c0_27 = arith.constant 0 : index
    %46 = vector.load %arg13[%c0_26, %c0_27] : memref<1x32xf32, #tpu.memory_space<vmem>>, vector<1x32xf32>
    %47 = vector.broadcast %46 : vector<1x32xf32> to vector<8x32xf32>
    %48 = arith.addf %45, %47 : vector<8x32xf32>
    %c0_28 = arith.constant 0 : index
    %c0_29 = arith.constant 0 : index
    %c0_30 = arith.constant 0 : index
    %49 = vector.load %arg14[%c0_28, %c0_29, %c0_30] : memref<1x8x32xf32, #tpu.memory_space<vmem>>, vector<1x8x32xf32>
    %50 = vector.shape_cast %49 : vector<1x8x32xf32> to vector<8x32xf32>
    %51 = vector.shape_cast %48 : vector<8x32xf32> to vector<1x8x32xf32>
    tpu.vector_store %arg14[%c0_28, %c0_29, %c0_30], %51 {strides = array<i32>} : memref<1x8x32xf32, #tpu.memory_space<vmem>>, vector<1x8x32xf32>,
    return
  }
  func.func @transform_0(%arg0: i32, %arg1: i32, %arg2: i32) -> (i32, i32, i32) {
    %c0_i32 = arith.constant 0 : i32
    %c0_i32_0 = arith.constant 0 : i32
    return %arg0, %arg1, %c0_i32 : i32, i32, i32
  }
  func.func @transform_1(%arg0: i32, %arg1: i32, %arg2: i32) -> (i32, i32, i32) {
    %c0_i32 = arith.constant 0 : i32
    %c0_i32_0 = arith.constant 0 : i32
    %c0_i32_1 = arith.constant 0 : i32
    return %arg0, %c0_i32, %c0_i32_0 : i32, i32, i32
  }
  func.func @transform_2(%arg0: i32, %arg1: i32, %arg2: i32) -> (i32, i32, i32) {
    %c0_i32 = arith.constant 0 : i32
    %c0_i32_0 = arith.constant 0 : i32
    %c0_i32_1 = arith.constant 0 : i32
    return %arg0, %c0_i32, %c0_i32_0 : i32, i32, i32
  }
  func.func @transform_3(%arg0: i32, %arg1: i32, %arg2: i32) -> (i32, i32, i32) {
    %c0_i32 = arith.constant 0 : i32
    %c0_i32_0 = arith.constant 0 : i32
    %c0_i32_1 = arith.constant 0 : i32
    return %arg2, %c0_i32, %c0_i32_0 : i32, i32, i32
  }
  func.func @transform_4(%arg0: i32, %arg1: i32, %arg2: i32) -> (i32, i32, i32) {
    %c0_i32 = arith.constant 0 : i32
    %c0_i32_0 = arith.constant 0 : i32
    %c0_i32_1 = arith.constant 0 : i32
    return %arg2, %c0_i32, %c0_i32_0 : i32, i32, i32
  }
  func.func @transform_5(%arg0: i32, %arg1: i32, %arg2: i32) -> (i32, i32, i32) {
    %c0_i32 = arith.constant 0 : i32
    %c0_i32_0 = arith.constant 0 : i32
    %c0_i32_1 = arith.constant 0 : i32
    return %arg2, %c0_i32, %c0_i32_0 : i32, i32, i32
  }
  func.func @transform_6(%arg0: i32, %arg1: i32, %arg2: i32) -> (i32, i32, i32) {
    %c0_i32 = arith.constant 0 : i32
    %c0_i32_0 = arith.constant 0 : i32
    %c0_i32_1 = arith.constant 0 : i32
    return %arg2, %c0_i32, %c0_i32_0 : i32, i32, i32
  }
  func.func @transform_7(%arg0: i32, %arg1: i32, %arg2: i32) -> (i32, i32, i32) {
    %c0_i32 = arith.constant 0 : i32
    %c0_i32_0 = arith.constant 0 : i32
    %c0_i32_1 = arith.constant 0 : i32
    return %arg2, %c0_i32, %c0_i32_0 : i32, i32, i32
  }
  func.func @transform_8(%arg0: i32, %arg1: i32, %arg2: i32) -> (i32, i32, i32) {
    %c0_i32 = arith.constant 0 : i32
    %c0_i32_0 = arith.constant 0 : i32
    %c0_i32_1 = arith.constant 0 : i32
    return %arg2, %c0_i32, %c0_i32_0 : i32, i32, i32
  }
  func.func @transform_9(%arg0: i32, %arg1: i32, %arg2: i32) -> (i32, i32, i32) {
    %c0_i32 = arith.constant 0 : i32
    %c0_i32_0 = arith.constant 0 : i32
    %c0_i32_1 = arith.constant 0 : i32
    return %arg2, %c0_i32, %c0_i32_0 : i32, i32, i32
  }
  func.func @transform_10(%arg0: i32, %arg1: i32, %arg2: i32) -> (i32, i32) {
    %c0_i32 = arith.constant 0 : i32
    %c0_i32_0 = arith.constant 0 : i32
    %c0_i32_1 = arith.constant 0 : i32
    return %c0_i32, %c0_i32_0 : i32, i32
  }
  func.func @transform_11(%arg0: i32, %arg1: i32, %arg2: i32) -> (i32, i32, i32) {
    %c0_i32 = arith.constant 0 : i32
    %c0_i32_0 = arith.constant 0 : i32
    return %arg0, %arg1, %c0_i32 : i32, i32, i32
  }
  func.func @transform_12(%arg0: i32, %arg1: i32, %arg2: i32) -> (i32, i32, i32, i32) {
    %c0_i32 = arith.constant 0 : i32
    %c0_i32_0 = arith.constant 0 : i32
    return %arg0, %arg2, %arg1, %c0_i32 : i32, i32, i32, i32
  }
}

</mosaic_0001>

<bundles_post_ra>
// kernel: tpu_custom_call.1
= control target key start
LH: loop header
LB: loop body
LE: loop exit
PB: predicated region body
PF: predicated region fallthrough
CT: control target
= control target key end

     0   :  { %s2189_s0 = inlined_call_operand.vmem [shape: f32[2,8,32], index: 0, kind: input, shape index: {}]   ;;  %s2190_s1 = inlined_call_operand.vmem [shape: f32[2,8,32], index: 1, kind: input, shape index: {}]   ;;  %s2191_s2 = inlined_call_operand.vmem [shape: f32[2,8,32], index: 2, kind: input, shape index: {}]   ;;  %s2192_s3 = inlined_call_operand.vmem [shape: bf16[1,32,32], index: 3, kind: input, shape index: {}]   ;;  %s2193_s4 = inlined_call_operand.vmem [shape: f32[1,32,1], index: 4, kind: input, shape index: {}]   ;;  %s2194_s5 = inlined_call_operand.vmem [shape: bf16[1,32,32], index: 5, kind: input, shape index: {}]   ;;  %s2195_s6 = inlined_call_operand.vmem [shape: f32[1,32,1], index: 6, kind: input, shape index: {}]   ;;  %s2196_s7 = inlined_call_operand.vmem [shape: bf16[1,32,32], index: 7, kind: input, shape index: {}]   ;;  %s2197_s8 = inlined_call_operand.vmem [shape: f32[1,32,1], index: 8, kind: input, shape index: {}]   ;;  %s2198_s9 = inlined_call_operand.hbm [shape: bf16[1,32,32], index: 9, kind: input, shape index: {}]   ;;  %s2199_s10 = inlined_call_operand.vmem [shape: f32[1,32], index: 10, kind: input, shape index: {}]   ;;  %s2200_s11 = inlined_call_operand.hbm [shape: f32[2,8,32], index: 11, kind: output, shape index: {0}]   ;;  %s2201_s12 = inlined_call_operand.hbm [shape: bf16[2,4,8,8], index: 12, kind: output, shape index: {1}]  }
   0x1   :  { %2204 = sst [smem:[#allocation16_spill]] %s2189_s0 }
   0x2   :  { %2205 = sst [smem:[#allocation17_spill]] %s2190_s1 }
   0x3   :  { %2206 = sst [smem:[#allocation18_spill]] %s2191_s2 }
   0x4   :  { %2207 = sst [smem:[#allocation19_spill]] %s2192_s3 }
   0x5   :  { %2208 = sst [smem:[#allocation20_spill]] %s2198_s9 }
   0x6   :  { %18 = vsyncpa [#allocation6], 0 }
   0x7   :  { %19 = vsyncpa [#allocation7], 0 }
   0x8   :  { %21 = vsyncpa [#allocation7 + $0x1], 0 }
   0x9   :  { %22 = vsyncpa [#allocation10], 0 }
   0xa   :  { %24 = vsyncpa [#allocation10 + $0x1], 0  ;;  %s1933_s21 = smov 0   ;;  %s1935_s22 = smov 0  }
   0xb   :  { %s1937_s23 = smov 0   ;;  %s1939_s24 = smov 0  }
   0xc   :  { %s1941_s25 = smov 0   ;;  %s1943_s26 = smov 0  }
   0xd LB: > { %2209 = sst [smem:[#allocation14_spill]] %s1856_s25  ;;  %s1543_s27 = sadd.s32 4294967295, %s1860_s26   ;;  %s1860_s26 = sphi %s1943_s26, %s30_s26   ;;  %s1856_s25 = sphi %s1941_s25, %s2219_s25   ;;  %s1852_s24 = sphi %s1939_s24, %s2218_s24   ;;  %s1848_s23 = sphi %s1937_s23, %s2222_s23   ;;  %s1844_s22 = sphi %s1935_s22, %s2221_s22   ;;  %s1840_s21 = sphi %s1933_s21, %s2220_s21  }
   0xe   : > { %s1544_s28 = sadd.s32 4294967294, %s1860_s26   ;;  %s49_s29 = sadd.s32 1, %s1856_s25 }
   0xf   : > { %s341_s30 = sadd.s32 1, %s1848_s23  ;;  %p51_p0 = scmp.ge.s32.totalorder %s49_s29, 2 }
  0x10   : > { %p351_p1 = scmp.ne.s32.totalorder %s1848_s23, %s1844_s22  ;;  %p352_p2 = scmp.eq.s32.totalorder %s1543_s27, 1 }
  0x11   : > { %p357_p3 = scmp.ne.s32.totalorder %s1844_s22, %s1840_s21  ;;  %s2224_s29 = smov (%p51_p0, %s49_s29), 0 }
  0x12   : > { %2210 = sst [smem:[#allocation15_spill]] %s2224_s29  ;;  %p1973_p4 = por %p352_p2, %p351_p1 }
  0x13   : > { %p358_p5 = scmp.eq.s32.totalorder %s1544_s28, 1  ;;  %s336_s14 = ssub.s32 %s1856_s25, %s2224_s29 }
  0x14   : > { %p1545_p6 = scmp.ge.s32.totalorder %s1860_s26, 1  ;;  %p339_p7 = scmp.eq.s32.totalorder %s336_s14, 0 }
  0x15   : > { %p1980_p8 = por %p358_p5, %p357_p3  ;;  %p395_p9 = scmp.lt.s32.totalorder %s1860_s26, 3 }
  0x16   : > { %s1986_s16 = scalar_select %p339_p7, %s1848_s23, %s341_s30  }
  0x17   : > { %p396_p10 = pnand %p1545_p6, %p395_p9  ;;  %p1636_p11 = scmp.eq.s32.totalorder %s1543_s27, 0 }
  0x18   : > { %s2213_s9 = sld [smem:[#allocation20_spill]]  ;;  %s1862_s20 = smov [#allocation5]  }
  0x19   : > { %p1625_p12 = pneg %p396_p10  ;;  %s459_s28 = sshll.u32 %s1862_s20, 4  ;;  %s460_s28 = int_to_ptr.vmem [resolvable:$true] %s459_s28 }
  0x1a   : > { %s1863_s14 = smov 64   ;;  %s1864_s29 = smov 4  }
  0x1b   : > { %p1626_p13 = pnand %p1636_p11, %p1625_p12  ;;  %502 = sbr.rel (%p396_p10) target bundleno = 1067 (0x42b), region = 64 }
  0x1e   : > { %s457_s19 = sshll.u32 %s2213_s9, 4  ;;  %s458_s19 = int_to_ptr.hbm [resolvable:$true] %s457_s19 }
  0x1f   : > { %1628 = dma.hbm_to_vmem [thread:$0]  (!%p1626_p13), %s458_s19, 256, %s460_s28, [#allocation6], %s1863_s14, %s1863_s14, %s1864_s29  }
  0x20   : > { %1827 = dma.done.wait (%p1636_p11), [#allocation6], 256  }
  0x21   : > { %1829 = vsyncadd (%p1636_p11), [#allocation6], 4294967040  ;;  %p590_p0 = scmp.lt.s32.totalorder %s1852_s24, 1  ;;  %v1865_v0 = vmov 0   ;;  %s2214_s0 = sld [smem:[#allocation16_spill]]  ;;  %vm683_vm0 = vcmask 261120  }
  0x22   : > { %1694 = vset.pattern.permute.xlu1 %v1865_v0  ;;  %1693 = vset.pattern.permute.xlu0 %v1865_v0  ;;  %s2215_s1 = sld [smem:[#allocation17_spill]]  ;;  %v807_v5 = vld [vmem:[%s2193_s4 + $0x8] sm:$0xff]  ;;  %v806_v6 = vld [vmem:[%s2193_s4] sm:$0xff]  ;;  %v808_v9 = vld [vmem:[%s2193_s4 + $0x10] sm:$0xff]  ;;  %vm785_vm1 = vcmask 60416   ;;  %vm906_vm2 = vcmask 1043456  }
  0x23   : > { %s591_s27 = scalar_select %p590_p0, %s1852_s24, 1  ;;  %1695 = vset.pattern.permute.xlu2 %v1865_v0  ;;  %817 = vperm.xlu1 %1694, %v807_v5   ;;  %v1610_v11 = vld [vmem:[%s2194_s5] sm:$0xff]  ;;  %v650_v12 = vld [vmem:[%s2195_s6 + $0x8] sm:$0xff]  ;;  %v651_v14 = vld [vmem:[%s2195_s6 + $0x10] sm:$0xff]  ;;  %vm902_vm3 = vcmask 64512  }
  0x24   : > { %812 = vperm.xlu0 %1693, %v806_v6   ;;  %822 = vperm.xlu2 %1695, %v808_v9   ;;  %s2216_s3 = sld [smem:[#allocation19_spill]]  ;;  %v649_v13 = vld [vmem:[%s2195_s6] sm:$0xff]  ;;  %v809_v15 = vld [vmem:[%s2193_s4 + $0x18] sm:$0xff]  ;;  %v1611_v18 = vld [vmem:[%s2194_s5 + $0x8] sm:$0xff]  ;;  %s2100_s9 = sand.u32 1, %s1844_s22  }
  0x25   : > { %s1993_s30 = sshll.u32 %s591_s27, 3  ;;  %v652_v16 = vld [vmem:[%s2195_s6 + $0x18] sm:$0xff]  ;;  %s2217_s2 = sld [smem:[#allocation18_spill]]  ;;  %v1612_v38 = vld [vmem:[%s2196_s7] sm:$0xff]  ;;  %v717_v61 = vld [vmem:[%s2197_s8 + $0x8] sm:$0xff] }
  0x26   : > { %s1557_s29 = sshll.u32 %s2100_s9, 4 }
  0x27   : > { %s596_s20 = scalar_lea.vmem %s2214_s0, %s1993_s30  ;;  %s2104_s25 = scalar_lea.vmem [#allocation9], %s1557_s29 }
  0x28   : > { %s600_s28 = scalar_lea.vmem %s2215_s1, %s1993_s30  ;;  %v800_v1 = vld [vmem:[%s596_s20] sm:$0xff]  ;;  %s1290_s19 = sshll.u32 %s2104_s25, 4  ;;  %s1291_s19 = int_to_ptr.vmem [resolvable:$true] %s1290_s19 }
  0x29   : > { %v641_v2 = vld [vmem:[%s600_s28] sm:$0xff]  ;;  %v801_v3 = vpack.c.bf16 %v800_v1, %v800_v1  ;;  %s1616_s28 = sshll.u32 %s1852_s24, 4 }
  0x2a   : > { %v642_v4 = vpack.c.bf16 %v641_v2, %v641_v2  ;;  %v1614_v10 = vld [vmem:[%s2216_s3] sm:$0xff]  ;;  %v1615_v17 = vld [vmem:[%s2216_s3 + $0x8] sm:$0xff]  ;;  %s1289_s17 = scalar_lea.hbm %s2201_s12, %s1616_s28 }
  0x2b   : > { %v848_v7 = vsel %vm683_vm0, %v801_v3, 0  ;;  %660 = vperm.xlu1 %1694, %v650_v12   ;;  %s604_s20 = scalar_lea.vmem %s2217_s2, %s1993_s30  ;;  %s1292_s18 = sshll.u32 %s1289_s17, 4  ;;  %s1293_s18 = int_to_ptr.hbm [resolvable:$true] %s1292_s18 }
  0x2c   : > { %v691_v8 = vsel %vm683_vm0, %v642_v4, 0  ;;  %857 = vmatpush.bf16.xpose.msra.mxu2 %v848_v7  ;;  %655 = vperm.xlu0 %1693, %v649_v13   ;;  %v643_v27 = vld [vmem:[%s604_s20] sm:$0xff]  ;;  %s1260_s20 = scalar_lea.sflag [#allocation10], %s2100_s9  ;;  %s1760_s30 = sshra.s32 %s1293_s18, 4  ;;  %s1761_s30 = int_to_ptr.hbm [resolvable:$true] %s1760_s30 }
  0x2d   : > { %700 = vmatpush.bf16.xpose.msra.mxu0 %v691_v8  ;;  %665 = vperm.xlu2 %1695, %v651_v14   ;;  %v644_v28 = vpack.c.bf16 %v643_v27, %v643_v27  ;;  %s1762_s29 = scalar_lea.hbm %s1761_s30, 16  ;;  %p1767_p5 = scmp.lt.s32.totalorder %s1761_s30, %s2201_s12 }
  0x2e   : > { %p1763_p1 = scmp.ne.s32.totalorder %s1761_s30, %s1762_s29 }
  0x2f   : > { %v757_v32 = vsel %vm683_vm0, %v644_v28, 0 }
  0x30   : > { %766 = vmatpush.bf16.xpose.msra.mxu1 %v757_v32  ;;  %p1764_p2 = pnand %p1763_p1, %p1973_p4 }
  0x32   : > { %p1765_p3 = pneg %p1764_p2 }
  0x33   : > { %1589 = vmatmul.msk.bf16.vlgmr.msra.gmra.mxu2 %vm683_vm0, %v1614_v10  ;;  %827 = vperm.xlu1 %1694, %v809_v15  }
  0x34   : > { %1569 = vmatmul.msk.bf16.vlgmr.msra.gmra.mxu0 %vm683_vm0, %v1610_v11  ;;  %v1613_v11 = vld [vmem:[%s2196_s7 + $0x8] sm:$0xff] }
  0x35   : > { %670 = vperm.xlu2 %1695, %v652_v16  }
  0x37   : > { %1579 = vmatmul.msk.bf16.vlgmr.msra.gmra.mxu1 %vm683_vm0, %v1612_v38 }
  0x43   : > { %1590 = vmatmul.msk.bf16.gmra.mxu2 %vm683_vm0, %v1615_v17 }
  0x44   : > { %1570 = vmatmul.msk.bf16.gmra.mxu0 %vm683_vm0, %v1611_v18 }
  0x47   : > { %1580 = vmatmul.msk.bf16.gmra.mxu1 %vm683_vm0, %v1613_v11 }
  0x7e   : > { %v823_v24 = vpop.permute.xlu2 %822 }
  0x87   : > { %v666_v35 = vpop.permute.xlu2 %665 }
  0x8f   : > { %v671_v49 = vpop.permute.xlu2 %670 }
  0x95   : > { %v818_v20 = vpop.permute.xlu1 %817 }
  0x96   : > { %v813_v19 = vpop.permute.xlu0 %812 }
  0x9d   : > { %v661_v29 = vpop.permute.xlu1 %660 }
  0x9e   : > { %v656_v21 = vpop.permute.xlu0 %655 }
  0xa5   : > { %v828_v55 = vpop.permute.xlu1 %827 }
  0xb1   : > { %v702_v22 = vpop.f32.mrf.mxu0 }
  0xb2   : > { %v703_v23 = vadd.f32 %v702_v22, %v656_v21  ;;  %v718_v21 = vld [vmem:[%s2197_s8 + $0x10] sm:$0xff] }
  0xb4   : > { %v778_v25 = vpack.c.bf16 %v703_v23, %v703_v23  ;;  %v2069_v4 = vpop.f32.mrf.mxu1 }
  0xb6   : > { %786 = vst.msk [vmem:[#allocation3] sm:$0xf] %vm785_vm1, %v778_v25  ;;  %v859_v26 = vpop.f32.mrf.mxu2  ;;  %v716_v25 = vld [vmem:[%s2197_s8] sm:$0xff] }
  0xb7   : > { %v860_v36 = vadd.f32 %v859_v26, %v813_v19 }
  0xb9   : > { %v704_v30 = vpop.f32.mrf.mxu0  ;;  %v869_v42 = vpack.c.bf16 %v860_v36, %v860_v36 }
  0xba   : > { %v705_v31 = vadd.f32 %v704_v30, %v661_v29 }
  0xbc   : > { %v779_v33 = vpack.c.bf16 %v705_v31, %v705_v31  ;;  %v770_v5 = vpop.f32.mrf.mxu1 }
  0xbd   : > { %v876_v34 = vld [vmem:[#allocation3] sm:$0xf] }
  0xbe   : > { %787 = vst.msk [vmem:[#allocation3 + $0x4] sm:$0xf] %vm785_vm1, %v779_v33  ;;  %v908_v37 = vsel %vm906_vm2, %v876_v34, 0  ;;  %v861_v39 = vpop.f32.mrf.mxu2 }
  0xbf   : > { %917 = vmatpush.bf16.msra.mxu3 %v908_v37  ;;  %v862_v40 = vadd.f32 %v861_v39, %v818_v20 }
  0xc1   : > { %v707_v41 = vpop.f32.mrf.mxu0  ;;  %v870_v43 = vpack.c.bf16 %v862_v40, %v862_v40 }
  0xc2   : > { %v708_v44 = vadd.f32 %v707_v41, %v666_v35 }
  0xc3   : > { %1696 = vxpose.binary.xlu0.c.b16.start.end [1/2] (short) (narrow) %v870_v43, %v869_v42, 16 }
  0xc4   : > { %v780_v45 = vpack.c.bf16 %v708_v44, %v708_v44  ;;  %v773_v34 = vpop.f32.mrf.mxu1 }
  0xc5   : > { %v877_v46 = vld [vmem:[#allocation3 + $0x4] sm:$0xf] }
  0xc6   : > { %v943_v47 = vsel %vm906_vm2, %v877_v46, 0  ;;  %788 = vst.msk [vmem:[#allocation3 + $0x8] sm:$0xf] %vm785_vm1, %v780_v45  ;;  %v864_v48 = vpop.f32.mrf.mxu2 }
  0xc7   : > { %952 = vmatpush.bf16.msrb.mxu3 %v943_v47  ;;  %v865_v50 = vadd.f32 %v864_v48, %v823_v24 }
  0xc9   : > { %v709_v51 = vpop.f32.mrf.mxu0  ;;  %v871_v52 = vpack.c.bf16 %v865_v50, %v865_v50 }
  0xca   : > { %v710_v53 = vadd.f32 %v709_v51, %v671_v49 }
  0xcb   : > { %958 = vxpose.xlu1.c.b16.start.end [1/1] (short) (narrow) %v871_v52, 16 }
  0xcc   : > { %v781_v54 = vpack.c.bf16 %v710_v53, %v710_v53 }
  0xcd   : > { %v878_v62 = vld [vmem:[#allocation3 + $0x8] sm:$0xf] }
  0xce   : > { %789 = vst.msk [vmem:[#allocation3 + $0xc] sm:$0xf] %vm785_vm1, %v781_v54  ;;  %v866_v56 = vpop.f32.mrf.mxu2  ;;  %v978_v0 = vsel %vm906_vm2, %v878_v62, 0 }
  0xcf   : > { %v867_v57 = vadd.f32 %v866_v56, %v828_v55 }
  0xd1   : > { %v872_v58 = vpack.c.bf16 %v867_v57, %v867_v57  ;;  %v719_v57 = vld [vmem:[%s2197_s8 + $0x18] sm:$0xff] }
  0xd3   : > { %993 = vxpose.xlu2.c.b16.start.end [1/1] (short) (narrow) %v872_v58, 16 }
  0xd5   : > { %v879_v59 = vld [vmem:[#allocation3 + $0xc] sm:$0xf] }
  0xd6   : > { %v1013_v60 = vsel %vm906_vm2, %v879_v59, 0 }
  0xd7   : > { %1022 = vmatpush.bf16.msrb.mxu0 %v1013_v60 }
 0x131   : > { %727 = vperm.xlu0 %1693, %v717_v61  }
 0x16f   : > { %v1697_v63 = vpop.trf.xlu0 }
 0x170   : > { %1591 = vmatmul.msk.bf16.vlgmr.msra.gmra.mxu3 %vm902_vm3, %v1697_v63 }
 0x171   : > { %987 = vmatpush.bf16.msra.mxu3 %v978_v0 }
 0x174   : > { %v1001_v1 = vpop.trf.xlu2 }
 0x175   : > { %1594 = vmatmul.msk.bf16.vlgmr.msrb.gmra.mxu0 %vm902_vm3, %v1001_v1 }
 0x177   : > { %v1698_v2 = vpop.trf.xlu0  ;;  %v966_v3 = vpop.trf.xlu1 }
 0x180   : > { %1592 = vmatmul.msk.bf16.vlgmr.msrb.gmra.mxu3 %vm902_vm3, %v1698_v2 }
 0x190   : > { %1593 = vmatmul.msk.bf16.vlgmr.msra.gmra.mxu3 %vm902_vm3, %v966_v3 }
 0x1a3   : > { %v728_v6 = vpop.permute.xlu0 %727 }
 0x1a4   : > { %v771_v7 = vadd.f32 %v770_v5, %v728_v6 }
 0x1a6   : > { %v791_v8 = vpack.c.bf16 %v771_v7, %v771_v7 }
 0x1a8   : > { %797 = vst.msk [vmem:[#allocation4 + $0x4] sm:$0xf] %vm785_vm1, %v791_v8  ;;  %v775_v8 = vpop.f32.mrf.mxu1 }
 0x1af   : > { %v883_v9 = vld [vmem:[#allocation4 + $0x4] sm:$0xf] }
 0x1b0   : > { %v1104_v10 = vsel %vm902_vm3, %v883_v9, 0 }
 0x1b1   : > { %1113 = vmatpush.bf16.xpose.msrb.mxu2 %v1104_v10 }
 0x1f2   : > { %v1024_v12 = vpop.f32.mrf.mxu0 }
 0x1f3   : > { %v919_v13 = vpop.f32.mrf.mxu3  ;;  %v1037_v19 = vsel %vm902_vm3, %v1024_v12, -inf }
 0x1f4   : > { %v1028_v14 = vsel %vm902_vm3, %v919_v13, -inf }
 0x1f5   : > { %1029 = vmax.xlane.f32.xlu1 %v1028_v14 }
 0x1fa   : > { %v1026_v15 = vpop.f32.mrf.mxu0 }
 0x1fb   : > { %v921_v16 = vpop.f32.mrf.mxu3 }
 0x1fc   : > { %v1157_v16 = vld [vmem:[#allocation5] sm:$0xf] }
 0x203   : > { %v954_v17 = vpop.f32.mrf.mxu3 }
 0x204   : > { %v1031_v18 = vsel %vm902_vm3, %v954_v17, -inf }
 0x205   : > { %1032 = vmax.xlane.f32.xlu0 %v1031_v18  ;;  %v1158_v18 = vld [vmem:[#allocation5 + $0x4] sm:$0xf] }
 0x20b   : > { %v956_v20 = vpop.f32.mrf.mxu3 }
 0x20d   : > { %1038 = vmax.xlane.f32.xlu0 %v1037_v19  ;;  %v1188_v19 = vsel %vm906_vm2, %v1158_v18, 0 }
 0x20e   : > { %732 = vperm.xlu1 %1694, %v718_v21   ;;  %1197 = vmatpush.bf16.msra.mxu2 %v1188_v19 }
 0x213   : > { %v989_v22 = vpop.f32.mrf.mxu3 }
 0x214   : > { %v1034_v23 = vsel %vm902_vm3, %v989_v22, -inf }
 0x215   : > { %1035 = vmax.xlane.f32.xlu2 %v1034_v23 }
 0x21b   : > { %v991_v24 = vpop.f32.mrf.mxu3 }
 0x221   : > { %722 = vperm.xlu0 %1693, %v716_v25   ;;  %v1160_v25 = vld [vmem:[#allocation5 + $0xc] sm:$0xf] }
 0x268   : > { %v1030_v26 = vpop.xlane.xlu1 %1029 }
 0x269   : > { %v1040_v27 = vsub.f32 %v919_v13, %v1030_v26  ;;  %v1226_v26 = vsel %vm906_vm2, %v1160_v25, 0 }
 0x26b   : > { %v1044_v28 = vmul.f32 1.442695, %v1040_v27 }
 0x26d   : > { %1700 = vpow2.f32 %v1044_v28 }
 0x273   : > { %v1701_v29 = vpop.eup %1700 }
 0x274   : > { %v1052_v30 = vsel %vm902_vm3, %v1701_v29, 0.0 }
 0x275   : > { %1053 = vadd.xlane.f32.xlu1 %v1052_v30 }
 0x278   : > { %v1033_v31 = vpop.xlane.xlu0 %1032 }
 0x279   : > { %v1041_v32 = vsub.f32 %v954_v17, %v1033_v31  ;;  %v1169_v17 = vsel %vm906_vm2, %v1157_v16, 0 }
 0x27b   : > { %v1046_v33 = vmul.f32 1.442695, %v1041_v32 }
 0x27d   : > { %1702 = vpow2.f32 %v1046_v33 }
 0x280   : > { %v733_v35 = vpop.permute.xlu1 %732  ;;  %v1039_v36 = vpop.xlane.xlu0 %1038 }
 0x281   : > { %v774_v37 = vadd.f32 %v773_v34, %v733_v35  ;;  %v1043_v38 = vsub.f32 %v1024_v12, %v1039_v36 }
 0x283   : > { %v1703_v39 = vpop.eup %1702  ;;  %v792_v40 = vpack.c.bf16 %v774_v37, %v774_v37  ;;  %v1050_v41 = vmul.f32 1.442695, %v1043_v38 }
 0x284   : > { %v1055_v42 = vsel %vm902_vm3, %v1703_v39, 0.0 }
 0x285   : > { %798 = vst.msk [vmem:[#allocation4 + $0x8] sm:$0xf] %vm785_vm1, %v792_v40  ;;  %1704 = vpow2.f32 %v1050_v41  ;;  %1056 = vadd.xlane.f32.xlu2 %v1055_v42 }
 0x288   : > { %v1036_v43 = vpop.xlane.xlu2 %1035 }
 0x289   : > { %v1042_v44 = vsub.f32 %v989_v22, %v1036_v43  ;;  %v1159_v22 = vld [vmem:[#allocation5 + $0x8] sm:$0xf] }
 0x28a   : > { %v1207_v23 = vsel %vm906_vm2, %v1159_v22, 0 }
 0x28b   : > { %v1705_v45 = vpop.eup %1704  ;;  %v1048_v46 = vmul.f32 1.442695, %v1042_v44 }
 0x28c   : > { %v1061_v47 = vsel %vm902_vm3, %v1705_v45, 0.0  ;;  %v884_v48 = vld [vmem:[#allocation4 + $0x8] sm:$0xf] }
 0x28d   : > { %1706 = vpow2.f32 %v1048_v46  ;;  %1062 = vadd.xlane.f32.xlu0 %v1061_v47  ;;  %v1123_v49 = vsel %vm902_vm3, %v884_v48, 0 }
 0x28e   : > { %1132 = vmatpush.bf16.xpose.msrb.mxu3 %v1123_v49 }
 0x293   : > { %v1707_v50 = vpop.eup %1706  ;;  %v723_v51 = vpop.permute.xlu0 %722 }
 0x294   : > { %v769_v52 = vadd.f32 %v2069_v4, %v723_v51  ;;  %v1058_v53 = vsel %vm902_vm3, %v1707_v50, 0.0 }
 0x295   : > { %1059 = vadd.xlane.f32.xlu2 %v1058_v53 }
 0x296   : > { %v790_v54 = vpack.c.bf16 %v769_v52, %v769_v52  ;;  %1216 = vmatpush.bf16.msra.mxu3 %v1207_v23 }
 0x298   : > { %796 = vst.msk [vmem:[#allocation4] sm:$0xf] %vm785_vm1, %v790_v54 }
 0x29f   : > { %v882_v55 = vld [vmem:[#allocation4] sm:$0xf] }
 0x2a0   : > { %v1085_v56 = vsel %vm902_vm3, %v882_v55, 0 }
 0x2a1   : > { %1094 = vmatpush.bf16.xpose.msrb.mxu1 %v1085_v56 }
 0x2a9   : > { %1178 = vmatpush.bf16.msra.mxu1 %v1169_v17 }
 0x2ad   : > { %737 = vperm.xlu2 %1695, %v719_v57  }
 0x2e8   : > { %v1054_v58 = vpop.xlane.xlu1 %1053 }
 0x2e9   : > { %1708 = vrcp.f32 %v1054_v58 }
 0x2ef   : > { %v1709_v59 = vpop.eup %1708 }
 0x2f0   : > { %v1068_v60 = vmul.f32 %v1709_v59, %v1701_v29 }
 0x2f2   : > { %v1072_v61 = vpack.c.bf16 %v1068_v60, %v1068_v60 }
 0x2f4   : > { %1595 = vmatmul.msk.bf16.vlgmr.msrb.gmra.mxu1 %vm902_vm3, %v1072_v61  ;;  %1077 = vst.msk [vmem:[%s2104_s25] sm:$0xf] %vm785_vm1, %v1072_v61 }
 0x2f8   : > { %v1057_v62 = vpop.xlane.xlu2 %1056 }
 0x2f9   : > { %1710 = vrcp.f32 %v1057_v62 }
 0x2ff   : > { %v1711_v63 = vpop.eup %1710 }
 0x300   : > { %v1069_v0 = vmul.f32 %v1711_v63, %v1703_v39  ;;  %v1063_v1 = vpop.xlane.xlu0 %1062 }
 0x301   : > { %1712 = vrcp.f32 %v1063_v1 }
 0x302   : > { %v1073_v2 = vpack.c.bf16 %v1069_v0, %v1069_v0 }
 0x304   : > { %1596 = vmatmul.msk.bf16.vlgmr.msrb.gmra.mxu2 %vm902_vm3, %v1073_v2  ;;  %1078 = vst.msk [vmem:[%s2104_s25 + $0x4] sm:$0xf] %vm785_vm1, %v1073_v2 }
 0x307   : > { %v1713_v3 = vpop.eup %1712 }
 0x308   : > { %v1071_v4 = vmul.f32 %v1713_v3, %v1705_v45  ;;  %v1060_v5 = vpop.xlane.xlu2 %1059 }
 0x309   : > { %1714 = vrcp.f32 %v1060_v5 }
 0x30a   : > { %v1075_v6 = vpack.c.bf16 %v1071_v4, %v1071_v4 }
 0x30c   : > { %1080 = vst.msk [vmem:[%s2104_s25 + $0xc] sm:$0xf] %vm785_vm1, %v1075_v6 }
 0x30f   : > { %v1715_v7 = vpop.eup %1714 }
 0x310   : > { %v1070_v9 = vmul.f32 %v1715_v7, %v1707_v50  ;;  %v738_v10 = vpop.permute.xlu2 %737 }
 0x311   : > { %v776_v11 = vadd.f32 %v775_v8, %v738_v10 }
 0x312   : > { %v1074_v12 = vpack.c.bf16 %v1070_v9, %v1070_v9 }
 0x313   : > { %v793_v13 = vpack.c.bf16 %v776_v11, %v776_v11 }
 0x314   : > { %1597 = vmatmul.msk.bf16.vlgmr.msrb.gmra.mxu3 %vm902_vm3, %v1074_v12  ;;  %1079 = vst.msk [vmem:[%s2104_s25 + $0x8] sm:$0xf] %vm785_vm1, %v1074_v12  ;;  %s1766_s25 = scalar_lea.hbm %s2201_s12, 32 }
 0x315   : > { %799 = vst.msk [vmem:[#allocation4 + $0xc] sm:$0xf] %vm785_vm1, %v793_v13  ;;  %p1768_p6 = scmp.lt.s32.totalorder %s1766_s25, %s1762_s29 }
 0x317   : > { %p1769_p7 = por %p1768_p6, %p1767_p5 }
 0x319   : > { %p1770_p9 = pnand %p1769_p7, %p1765_p3 }
 0x31c   : > { %v885_v14 = vld [vmem:[#allocation4 + $0xc] sm:$0xf] }
 0x31d   : > { %v1142_v15 = vsel %vm902_vm3, %v885_v14, 0 }
 0x31e   : > { %1151 = vmatpush.bf16.xpose.msra.mxu0 %v1142_v15 }
 0x325   : > { %1598 = vmatmul.msk.bf16.vlgmr.msra.gmra.mxu0 %vm902_vm3, %v1075_v6 }
 0x326   : > { %1235 = vmatpush.bf16.msrb.mxu0 %v1226_v26 }
 0x371   : > { %v1096_v20 = vpop.f32.mrf.mxu1 }
 0x372   : > { %v1161_v21 = vpack.c.bf16 %v1096_v20, %v1096_v20 }
 0x374   : > { %1599 = vmatmul.msk.bf16.vlgmr.msra.gmra.mxu1 %vm902_vm3, %v1161_v21 }
 0x379   : > { %v1098_v24 = vpop.f32.mrf.mxu1 }
 0x387   : > { %v1115_v27 = vpop.f32.mrf.mxu2 }
 0x388   : > { %v1162_v28 = vpack.c.bf16 %v1115_v27, %v1115_v27 }
 0x38a   : > { %1600 = vmatmul.msk.bf16.vlgmr.msra.gmra.mxu2 %vm902_vm3, %v1162_v28 }
 0x38f   : > { %v1117_v29 = vpop.f32.mrf.mxu2 }
 0x397   : > { %v1134_v30 = vpop.f32.mrf.mxu3 }
 0x398   : > { %v1163_v31 = vpack.c.bf16 %v1134_v30, %v1134_v30 }
 0x39a   : > { %1601 = vmatmul.msk.bf16.vlgmr.msra.gmra.mxu3 %vm902_vm3, %v1163_v31 }
 0x39f   : > { %v1136_v32 = vpop.f32.mrf.mxu3 }
 0x3a2   : > { %v1153_v33 = vpop.f32.mrf.mxu0 }
 0x3a3   : > { %v1164_v34 = vpack.c.bf16 %v1153_v33, %v1153_v33 }
 0x3a5   : > { %1602 = vmatmul.msk.bf16.vlgmr.msrb.gmra.mxu0 %vm902_vm3, %v1164_v34 }
 0x3aa   : > { %v1155_v35 = vpop.f32.mrf.mxu0 }
 0x3ab   : > { %1773 = shalt.err (!%p1770_p9)
}
 0x3ac   : > { %s1866_s28 = smov 64   ;;  %s1867_s14 = smov 4   ;;  %v1699_v47 = vld [vmem:[%s2199_s10] ss:$0 sm:$0xff] }
 0x3ad   : > { %1622 = dma.vmem_to_hbm [thread:$0]  (%p1973_p4), %s1291_s19, 256, %s1293_s18, %s1260_s20, %s1866_s28, %s1866_s28, %s1867_s14  }
 0x3ae   : > { %s1556_s0 = sshll.u32 %s2100_s9, 3  ;;  %s1605_s1 = sshll.u32 %s1852_s24, 3 }
 0x3af   : > { %s1271_s27 = scalar_lea.hbm %s2200_s11, %s1605_s1  ;;  %s582_s24 = scalar_lea.vmem [#allocation8], %s1556_s0 }
 0x3b0   : > { %s1273_s18 = sshll.u32 %s582_s24, 4  ;;  %s1275_s20 = sshll.u32 %s1271_s27, 4  ;;  %s1274_s18 = int_to_ptr.vmem [resolvable:$true] %s1273_s18  ;;  %s1276_s20 = int_to_ptr.hbm [resolvable:$true] %s1275_s20 }
 0x3b1   : > { %s1255_s30 = scalar_lea.sflag [#allocation7], %s2100_s9  ;;  %s1788_s29 = sshra.s32 %s1276_s20, 4  ;;  %s1789_s29 = int_to_ptr.hbm [resolvable:$true] %s1788_s29 }
 0x3b2   : > { %s1790_s25 = scalar_lea.hbm %s1789_s29, 8  ;;  %s1794_s0 = scalar_lea.hbm %s2200_s11, 16 }
 0x3b3   : > { %p1791_p10 = scmp.ne.s32.totalorder %s1789_s29, %s1790_s25  ;;  %p1795_p13 = scmp.lt.s32.totalorder %s1789_s29, %s2200_s11 }
 0x3b4   : > { %p1796_p0 = scmp.lt.s32.totalorder %s1794_s0, %s1790_s25 }
 0x3b5   : > { %p1792_p11 = pnand %p1791_p10, %p1973_p4 }
 0x3b6   : > { %p1797_p1 = por %p1796_p0, %p1795_p13 }
 0x3b7   : > { %p1793_p12 = pneg %p1792_p11 }
 0x3b9   : > { %p1798_p2 = pnand %p1797_p1, %p1793_p12 }
 0x3f1   : > { %v1180_v36 = vpop.f32.mrf.mxu1 }
 0x3f2   : > { %v1241_v42 = vsel %vm683_vm0, %v1180_v36, 0.0 }
 0x3f9   : > { %v1182_v37 = vpop.f32.mrf.mxu1 }
 0x40d   : > { %v1199_v38 = vpop.f32.mrf.mxu2 }
 0x40e   : > { %v1242_v40 = vsel %vm683_vm0, %v1199_v38, 0.0 }
 0x40f   : > { %v1243_v44 = vadd.f32 %v1242_v40, %v1241_v42 }
 0x415   : > { %v1201_v39 = vpop.f32.mrf.mxu2 }
 0x41d   : > { %v1218_v41 = vpop.f32.mrf.mxu3 }
 0x41e   : > { %v1244_v43 = vsel %vm683_vm0, %v1218_v41, 0.0 }
 0x41f   : > { %v1245_v45 = vadd.f32 %v1244_v43, %v1243_v44 }
 0x422   : > { %v1237_v46 = vpop.f32.mrf.mxu0 }
 0x423   : > { %v1246_v48 = vsel %vm683_vm0, %v1237_v46, 0.0 }
 0x424   : > { %v1247_v49 = vadd.f32 %v1246_v48, %v1245_v45 }
 0x425   : > { %v1220_v50 = vpop.f32.mrf.mxu3 }
 0x426   : > { %v1252_v51 = vadd.f32 %v1699_v47, %v1247_v49 }
 0x428   : > { %1253 = vst.msk [vmem:[%s582_s24] sm:$0xff] %vm683_vm0, %v1252_v51 }
 0x429   : > { %1801 = shalt.err (!%p1798_p2)
}
 0x42a   : > { %1621 = dma.vmem_to_hbm [thread:$0]  (%p1973_p4), %s1274_s18, 128, %s1276_s20, %s1255_s30   ;;  %v1239_v52 = vpop.f32.mrf.mxu0 }
 0x42b PF: > { %p1638_p3 = scmp.ge.s32.totalorder %s1860_s26, 2  ;;  %s1307_s9 = sand.u32 1, %s1840_s21  }
 0x42c   : > { %s1308_s3 = scalar_lea.sflag [#allocation7], %s1307_s9 }
 0x42d   : > { %p1630_p5 = pnand %p1638_p3, %p1980_p8 }
 0x42f   : > { %p1631_p6 = pneg %p1630_p5 }
 0x431   : > { %1831 = dma.done.wait (%p1631_p6), %s1308_s3, 128  }
 0x432   : > { %1833 = vsyncadd (%p1631_p6), %s1308_s3, 4294967168  ;;  %s1318_s27 = scalar_lea.sflag [#allocation10], %s1307_s9 }
 0x433   : > { %1835 = dma.done.wait (%p1631_p6), %s1318_s27, 256  }
 0x434   : > { %1837 = vsyncadd (%p1631_p6), %s1318_s27, 4294967040  ;;  %s30_s26 = sadd.s32 1, %s1860_s26   ;;  %s2218_s24 = sld [smem:[#allocation14_spill]] }
 0x435   : > { %p27_p7 = scmp.ge.s32.totalorder %s30_s26, 4   ;;  %s2219_s25 = sld [smem:[#allocation15_spill]] }
 0x436   : > { %s2220_s21 = smov %s1844_s22  ;;  %s2221_s22 = smov %s1848_s23 }
 0x437   : > { %s2222_s23 = smov %s1986_s16  ;;  %29 = sbr.rel (!%p27_p7) target bundleno = 13 (0xd), region = 154 }
 0x43c   :  { %1324 = vsyncpa [#allocation6], 1 }
 0x43d   :  { %1326 = vsyncpa [#allocation6 + $0x1], 1 }
 0x43e   :  { %1327 = vsyncpa [#allocation7], 1 }
 0x43f   :  { %1329 = vsyncpa [#allocation7 + $0x1], 1 }
 0x440   :  { %1330 = vsyncpa [#allocation10], 1 }
 0x441   :  { %1332 = vsyncpa [#allocation10 + $0x1], 1 }

</bundles_post_ra>
